<compile_context>
chip_gen: v7x
topology: tpu7x:2x2x1
jax: 0.10.0
libtpu: 0.0.40
codegen_flags: <defaults>
</compile_context>

<pallas_src>
import math

import jax
import jax.numpy as jnp
from jax.experimental import pallas as pl
from jax.experimental.pallas import tpu as pltpu


def _make_kernel(num_graphs: int, num_layers: int):
    # Unbiased (G-1) variance as in torch.Tensor.std.  G == 1 is guarded: torch would
    # produce NaN/inf, here the standardized output is all zeros (documented deviation).
    denom = float(max(num_graphs - 1, 1))

    def kernel(scales_ref, a_ref, xw_ref, p_ref, out_ref, e_acc):
        nb = pl.program_id(0)
        last_nb = pl.num_programs(0) - 1

        # ---- E = P @ relu(A @ XW), accumulated over node-row blocks ----
        @pl.when(nb == 0)
        def _init():
            e_acc[...] = jnp.zeros_like(e_acc)

        h = jnp.dot(a_ref[...], xw_ref[...], preferred_element_type=jnp.float32)
        h = jnp.maximum(h, 0.0)
        e_acc[...] += jnp.dot(p_ref[...], h.astype(p_ref.dtype),
                              preferred_element_type=jnp.float32)

        # ---- standardize over dim=0 (graphs) and emit all L layers, once ----
        @pl.when(nb == last_nb)
        def _emit():
            e = e_acc[...]
            mean = jnp.mean(e, axis=0, keepdims=True)
            centered = e - mean
            var = jnp.sum(centered * centered, axis=0, keepdims=True) / denom
            inv = pl.reciprocal(jnp.sqrt(var) + 1e-6, approx=False)   # [1, Hpad]
            std_w = centered * inv                                     # [G, Hpad]
            for l in range(num_layers):                                # static, small L
                out_ref[l] = (std_w * scales_ref[l]).astype(out_ref.dtype)

    return kernel


def gnn_weight_predictor(adj, x, w, pool, std_kaiming_normals,
                         *, matmul_dtype=jnp.bfloat16, node_block=None):
    """Predict standardized weight matrices for one or more target layers.

    std_kaiming_normals: scalar (single layer, returns [G, H]) or [L] array of per-layer
    kaiming scales (returns [L, G, H]).  Graph embeddings are computed once inside a
    single pallas_call and shared across all layers.
    """
    N, F = x.shape
    H = w.shape[1]
    G = pool.shape[0]

    scales = jnp.atleast_1d(jnp.asarray(std_kaiming_normals, dtype=jnp.float32))
    squeeze = jnp.ndim(std_kaiming_normals) == 0
    L = int(scales.shape[0])

    # Lane-dense output: pad H to a multiple of 128 (padded columns standardize to 0
    # exactly and are sliced off below).
    Hpad = (-(-H // 128)) * 128
    w_p = jnp.pad(w, ((0, 0), (0, Hpad - H)))

    # Pre-fold W into X (valid: relu((A@X)@W) == relu(A@(X@W))).  Tiny XLA matmul, done once.
    xw = jnp.dot(x.astype(matmul_dtype), w_p.astype(matmul_dtype),
                 preferred_element_type=jnp.float32).astype(matmul_dtype)

    # Row-block tiling of A (matching column blocks of P) for large N; degenerate single
    # block at small N.  For production N use node_block that is a multiple of 256 (>=512).
    if node_block is None:
        node_block = N
    assert N % node_block == 0, "node_block must divide N"
    assert node_block == N or node_block % 128 == 0, "tiled node_block must be lane-aligned"
    NB = N // node_block

    # bf16 operands halve the dominant N^2 HBM traffic and use the MXU's native bf16 path;
    # accumulation stays f32 via preferred_element_type.
    a_c = adj.astype(matmul_dtype)
    p_c = pool.astype(matmul_dtype)

    out = pl.pallas_call(
        _make_kernel(G, L),
        out_shape=jax.ShapeDtypeStruct((L, G, Hpad), jnp.float32),
        grid=(NB,),
        in_specs=[
            pl.BlockSpec(memory_space=pltpu.MemorySpace.SMEM),       # per-layer scales [L]
            pl.BlockSpec((node_block, N), lambda nb: (nb, 0)),       # A row block (streamed)
            pl.BlockSpec((N, Hpad), lambda nb: (0, 0)),              # XW (resident)
            pl.BlockSpec((G, node_block), lambda nb: (0, nb)),       # P column block
        ],
        out_specs=pl.BlockSpec((L, G, Hpad), lambda nb: (0, 0, 0)),  # resident accumulator-style
        scratch_shapes=[
            pltpu.VMEM((G, Hpad), jnp.float32),                      # E accumulator
        ],
        compiler_params=pltpu.CompilerParams(
            dimension_semantics=("arbitrary",),                      # reduction over node blocks
        ),
    )(scales, a_c, xw, p_c)

    out = out[..., :H]
    return out[0] if squeeze else out


def _reference(adj, x, w, pool, scale, matmul_dtype=jnp.bfloat16):
    """Pure-JAX reference with the same operand precision / contraction order as the kernel."""
    md = matmul_dtype
    xw = jnp.dot(x.astype(md), w.astype(md), preferred_element_type=jnp.float32).astype(md)
    h = jnp.maximum(jnp.dot(adj.astype(md), xw, preferred_element_type=jnp.float32), 0.0)
    e = jnp.dot(pool.astype(md), h.astype(md), preferred_element_type=jnp.float32)
    mean = e.mean(axis=0, keepdims=True)
    centered = e - mean
    denom = max(e.shape[0] - 1, 1)
    std = jnp.sqrt(jnp.sum(centered * centered, axis=0, keepdims=True) / denom)
    return centered / (std + 1e-6) * scale


def _make_demo_batch(key, num_graphs, nodes_per_graph, feat_dim):
    """Deterministic synthetic 'gnn_batch': node features + normalized block-diag adjacency."""
    N = num_graphs * nodes_per_graph
    kx, ka = jax.random.split(key)
    x = jax.random.normal(kx, (N, feat_dim), dtype=jnp.float32)
    graph_ids = jnp.repeat(jnp.arange(num_graphs), nodes_per_graph)            # [N]
    same_graph = (graph_ids[:, None] == graph_ids[None, :]).astype(jnp.float32)
    rand_edges = (jax.random.uniform(ka, (N, N)) < 0.3).astype(jnp.float32)
    rand_edges = jnp.maximum(rand_edges, rand_edges.T)                         # symmetric
    adj = same_graph * rand_edges + jnp.eye(N, dtype=jnp.float32)
    adj = adj / jnp.sum(adj, axis=1, keepdims=True)                            # row-normalize
    pool = (graph_ids[None, :] == jnp.arange(num_graphs)[:, None]).astype(jnp.float32)
    pool = pool / nodes_per_graph                                              # mean pooling [G, N]
    return adj, x, pool


if __name__ == "__main__":
    # Small shapes consistent with the module's forward:
    #   G graphs, nodes_per_graph nodes each; graph-embedding dim H = predicted weight columns.
    G = 8
    nodes_per_graph = 8
    N = G * nodes_per_graph     # 64 nodes total
    F = 16                      # input node-feature dim
    H = 32                      # graph-embedding dim

    key = jax.random.PRNGKey(0)
    kbatch, kw, kbig = jax.random.split(key, 3)

    adj, x, pool = _make_demo_batch(kbatch, G, nodes_per_graph, F)

    # Deterministic GNN weight (stands in for self.model's parameters).
    w = jax.random.normal(kw, (F, H), dtype=jnp.float32) * (1.0 / math.sqrt(F))

    # std_kaiming_normal = gain('relu') / sqrt(fan), as the module's __init__ computes.
    fan = H
    std_k = math.sqrt(2.0) / math.sqrt(fan)

    # ---- 1) exact module semantics: single layer, f32 operands (opt-in) ----
    out = gnn_weight_predictor(adj, x, w, pool, std_k, matmul_dtype=jnp.float32)
    out = jax.block_until_ready(out)
    ref = _reference(adj, x, w, pool, std_k, jnp.float32)
    assert out.shape == (G, H)
    assert jnp.allclose(out, ref, atol=1e-4, rtol=1e-4), "f32 path mismatch vs reference"

    # ---- 2) amortized path: 3 target layers from ONE pallas_call, bf16 operands (default) ----
    scales = jnp.array([std_k, 0.5 * std_k, 2.0 * std_k], dtype=jnp.float32)
    outs = gnn_weight_predictor(adj, x, w, pool, scales)
    outs = jax.block_until_ready(outs)
    assert outs.shape == (3, G, H)
    for i in range(3):
        ref_i = _reference(adj, x, w, pool, float(scales[i]), jnp.bfloat16)
        assert jnp.allclose(outs[i], ref_i, atol=2e-3, rtol=2e-3), \
            f"bf16 batched path mismatch for layer {i}"

    # ---- 3) tiled path: NB > 1 exercises the VMEM accumulation over node-row blocks ----
    G2, npg2 = 8, 32
    adj2, x2, pool2 = _make_demo_batch(kbig, G2, npg2, F)       # N = 256
    out2 = gnn_weight_predictor(adj2, x2, w, pool2, std_k, node_block=128)
    out2 = jax.block_until_ready(out2)
    ref2 = _reference(adj2, x2, w, pool2, std_k, jnp.bfloat16)
    assert out2.shape == (G2, H)
    assert jnp.allclose(out2, ref2, atol=2e-3, rtol=2e-3), "tiled (NB=2) path mismatch"

    print("KERNEL_OK")
</pallas_src>

<mosaic_0001>
module attributes {stable_mosaic.version = 11 : i64} {
  func.func @kernel(%arg0: i32, %arg1: memref<1xf32, #tpu.memory_space<smem>>, %arg2: memref<64x64xf32, #tpu.memory_space<vmem>>, %arg3: memref<64x128xf32, #tpu.memory_space<vmem>>, %arg4: memref<8x64xf32, #tpu.memory_space<vmem>>, %arg5: memref<1x8x128xf32, #tpu.memory_space<vmem>>, %arg6: memref<8x128xf32, #tpu.memory_space<vmem>>) attributes {dimension_semantics = [#tpu.dimension_semantics<arbitrary>], iteration_bounds = array<i64: 1>, scalar_prefetch = 0 : i64, scratch_operands = 1 : i64, tpu.core_type = #tpu.core_type<tc>, window_params = [{transform_indices = @transform_0, window_bounds = array<i64: 1>}, {transform_indices = @transform_1, window_bounds = array<i64: 64, 64>}, {pipeline_mode = #tpu.pipeline_mode<synchronous>, transform_indices = @transform_2, window_bounds = array<i64: 64, 128>}, {transform_indices = @transform_3, window_bounds = array<i64: 8, 64>}, {pipeline_mode = #tpu.pipeline_mode<synchronous>, transform_indices = @transform_4, window_bounds = array<i64: 1, 8, 128>}]} {
    %c0_i32 = arith.constant 0 : i32
    %0 = arith.cmpi eq, %arg0, %c0_i32 : i32
    %1 = arith.extui %0 : i1 to i32
    %c0_i32_0 = arith.constant 0 : i32
    %2 = arith.cmpi ne, %1, %c0_i32_0 : i32
    scf.if %2 {
      %cst_14 = arith.constant 0.000000e+00 : f32
      %16 = vector.broadcast %cst_14 : f32 to vector<8x128xf32>
      %c0_15 = arith.constant 0 : index
      %c0_16 = arith.constant 0 : index
      %17 = vector.load %arg6[%c0_15, %c0_16] : memref<8x128xf32, #tpu.memory_space<vmem>>, vector<8x128xf32>
      tpu.vector_store %arg6[%c0_15, %c0_16], %16 {strides = array<i32>} : memref<8x128xf32, #tpu.memory_space<vmem>>, vector<8x128xf32>,
    } else {
    }
    %c0 = arith.constant 0 : index
    %c0_1 = arith.constant 0 : index
    %3 = vector.load %arg2[%c0, %c0_1] : memref<64x64xf32, #tpu.memory_space<vmem>>, vector<64x64xf32>
    %c0_2 = arith.constant 0 : index
    %c0_3 = arith.constant 0 : index
    %4 = vector.load %arg3[%c0_2, %c0_3] : memref<64x128xf32, #tpu.memory_space<vmem>>, vector<64x128xf32>
    %cst = arith.constant dense<0.000000e+00> : vector<64x128xf32>
    %5 = tpu.matmul %3, %4, %cst {dimension_numbers = #tpu.dot_dimension_numbers<[1], [0], [0], [1], [0, 0, 1, 1], [], []>} : vector<64x64xf32>, vector<64x128xf32>, vector<64x128xf32> -> vector<64x128xf32>
    %cst_4 = arith.constant 0.000000e+00 : f32
    %6 = vector.broadcast %cst_4 : f32 to vector<64x128xf32>
    %7 = arith.maximumf %5, %6 : vector<64x128xf32>
    %c0_5 = arith.constant 0 : index
    %c0_6 = arith.constant 0 : index
    %8 = vector.load %arg6[%c0_5, %c0_6] : memref<8x128xf32, #tpu.memory_space<vmem>>, vector<8x128xf32>
    %c0_7 = arith.constant 0 : index
    %c0_8 = arith.constant 0 : index
    %9 = vector.load %arg4[%c0_7, %c0_8] : memref<8x64xf32, #tpu.memory_space<vmem>>, vector<8x64xf32>
    %cst_9 = arith.constant dense<0.000000e+00> : vector<8x128xf32>
    %10 = tpu.matmul %9, %7, %cst_9 {dimension_numbers = #tpu.dot_dimension_numbers<[1], [0], [0], [1], [0, 0, 1, 1], [], []>} : vector<8x64xf32>, vector<64x128xf32>, vector<8x128xf32> -> vector<8x128xf32>
    %11 = arith.addf %8, %10 : vector<8x128xf32>
    %c0_10 = arith.constant 0 : index
    %c0_11 = arith.constant 0 : index
    %12 = vector.load %arg6[%c0_10, %c0_11] : memref<8x128xf32, #tpu.memory_space<vmem>>, vector<8x128xf32>
    tpu.vector_store %arg6[%c0_10, %c0_11], %11 {strides = array<i32>} : memref<8x128xf32, #tpu.memory_space<vmem>>, vector<8x128xf32>,
    %c0_i32_12 = arith.constant 0 : i32
    %13 = arith.cmpi eq, %arg0, %c0_i32_12 : i32
    %14 = arith.extui %13 : i1 to i32
    %c0_i32_13 = arith.constant 0 : i32
    %15 = arith.cmpi ne, %14, %c0_i32_13 : i32
    scf.if %15 {
      %c0_14 = arith.constant 0 : index
      %c0_15 = arith.constant 0 : index
      %16 = vector.load %arg6[%c0_14, %c0_15] : memref<8x128xf32, #tpu.memory_space<vmem>>, vector<8x128xf32>
      %cst_16 = arith.constant dense<0.000000e+00> : vector<128xf32>
      %17 = vector.multi_reduction <add>, %16, %cst_16 [0] : vector<8x128xf32> to vector<128xf32>
      %18 = vector.shape_cast %17 : vector<128xf32> to vector<1x128xf32>
      %cst_17 = arith.constant 8.000000e+00 : f32
      %19 = vector.broadcast %cst_17 : f32 to vector<1x128xf32>
      %20 = arith.divf %18, %19 : vector<1x128xf32>
      %21 = vector.broadcast %20 : vector<1x128xf32> to vector<8x128xf32>
      %22 = arith.subf %16, %21 : vector<8x128xf32>
      %23 = arith.mulf %22, %22 : vector<8x128xf32>
      %cst_18 = arith.constant dense<0.000000e+00> : vector<128xf32>
      %24 = vector.multi_reduction <add>, %23, %cst_18 [0] : vector<8x128xf32> to vector<128xf32>
      %25 = vector.shape_cast %24 : vector<128xf32> to vector<1x128xf32>
      %cst_19 = arith.constant 7.000000e+00 : f32
      %26 = vector.broadcast %cst_19 : f32 to vector<1x128xf32>
      %27 = arith.divf %25, %26 : vector<1x128xf32>
      %28 = math.sqrt %27 : vector<1x128xf32>
      %cst_20 = arith.constant 9.99999997E-7 : f32
      %29 = vector.broadcast %cst_20 : f32 to vector<1x128xf32>
      %30 = arith.addf %28, %29 : vector<1x128xf32>
      %31 = tpu.reciprocal %30 : vector<1x128xf32> -> vector<1x128xf32>
      %32 = vector.broadcast %31 : vector<1x128xf32> to vector<8x128xf32>
      %33 = arith.mulf %22, %32 : vector<8x128xf32>
      %c0_21 = arith.constant 0 : index
      %34 = memref.load %arg1[%c0_21] : memref<1xf32, #tpu.memory_space<smem>>
      %35 = vector.broadcast %34 : f32 to vector<8x128xf32>
      %36 = arith.mulf %33, %35 : vector<8x128xf32>
      %c0_22 = arith.constant 0 : index
      %c0_23 = arith.constant 0 : index
      %c0_24 = arith.constant 0 : index
      %37 = vector.load %arg5[%c0_22, %c0_23, %c0_24] : memref<1x8x128xf32, #tpu.memory_space<vmem>>, vector<1x8x128xf32>
      %38 = vector.shape_cast %37 : vector<1x8x128xf32> to vector<8x128xf32>
      %39 = vector.shape_cast %36 : vector<8x128xf32> to vector<1x8x128xf32>
      tpu.vector_store %arg5[%c0_22, %c0_23, %c0_24], %39 {strides = array<i32>} : memref<1x8x128xf32, #tpu.memory_space<vmem>>, vector<1x8x128xf32>,
    } else {
    }
    return
  }
  func.func @transform_0(%arg0: i32) -> i32 {
    %c0_i32 = arith.constant 0 : i32
    %c0_i32_0 = arith.constant 0 : i32
    return %c0_i32 : i32
  }
  func.func @transform_1(%arg0: i32) -> (i32, i32) {
    %c0_i32 = arith.constant 0 : i32
    %c0_i32_0 = arith.constant 0 : i32
    return %arg0, %c0_i32 : i32, i32
  }
  func.func @transform_2(%arg0: i32) -> (i32, i32) {
    %c0_i32 = arith.constant 0 : i32
    %c0_i32_0 = arith.constant 0 : i32
    %c0_i32_1 = arith.constant 0 : i32
    return %c0_i32, %c0_i32_0 : i32, i32
  }
  func.func @transform_3(%arg0: i32) -> (i32, i32) {
    %c0_i32 = arith.constant 0 : i32
    %c0_i32_0 = arith.constant 0 : i32
    return %c0_i32, %arg0 : i32, i32
  }
  func.func @transform_4(%arg0: i32) -> (i32, i32, i32) {
    %c0_i32 = arith.constant 0 : i32
    %c0_i32_0 = arith.constant 0 : i32
    %c0_i32_1 = arith.constant 0 : i32
    %c0_i32_2 = arith.constant 0 : i32
    return %c0_i32, %c0_i32_0, %c0_i32_1 : i32, i32, i32
  }
}

</mosaic_0001>

<bundles_post_ra>
// kernel: tpu_custom_call.1
= control target key start
LH: loop header
LB: loop body
LE: loop exit
PB: predicated region body
PF: predicated region fallthrough
CT: control target
= control target key end

     0   :  { %10 = vsyncpa [#allocation5], 0  ;;  %s612_s0 = inlined_call_operand.<no memory space> [shape: f32[1], index: 0, kind: input, shape index: {}]   ;;  %s613_s1 = inlined_call_operand.hbm [shape: f32[64,64], index: 1, kind: input, shape index: {}]   ;;  %s614_s2 = inlined_call_operand.hbm [shape: f32[64,128], index: 2, kind: input, shape index: {}]   ;;  %s615_s3 = inlined_call_operand.vmem [shape: f32[8,64], index: 3, kind: input, shape index: {}]   ;;  %s616_s4 = inlined_call_operand.hbm [shape: f32[1,8,128], index: 4, kind: output, shape index: {}]  }
   0x1   :  { %11 = vsyncpa [#allocation8], 0 }
   0x2   :  { %12 = vsyncpa [#allocation6], 0  ;;  %s528_s15 = smov [#allocation4]   ;;  %s456_s19 = scalar_lea.hbm %s613_s1, 1024 }
   0x3   :  { %s20_s16 = sshll.u32 %s528_s15, 4  ;;  %p457_p0 = scmp.ne.s32.totalorder %s613_s1, %s456_s19  ;;  %s21_s16 = int_to_ptr.vmem [resolvable:$true] %s20_s16 }
   0x4   :  { %p460_p1 = scmp.lt.u32.totalorder %s456_s19, %s613_s1 }
   0x6   :  { %p462_p2 = pnand %p460_p1, %p457_p0 }
   0x8   :  { %465 = shalt.err (!%p462_p2)
}
   0x9   :  { %s466_s24 = scalar_lea.vmem %s21_s16, 1024  ;;  %p471_p4 = scmp.lt.s32.totalorder %s21_s16, %s21_s16 }
   0xa   :  { %p467_p3 = scmp.ne.s32.totalorder %s21_s16, %s466_s24  ;;  %p472_p5 = scmp.lt.s32.totalorder %s466_s24, %s466_s24 }
   0xc   :  { %p473_p6 = por %p472_p5, %p471_p4 }
   0xe   :  { %p474_p7 = pnand %p473_p6, %p467_p3 }
  0x10   :  { %477 = shalt.err (!%p474_p7)
}
  0x11   :  { %s529_s25 = smov 128   ;;  %s530_s26 = smov 8  }
  0x12   :  { %26 = dma.hbm_to_vmem [thread:$0]  %s613_s1, 1024, %s21_s16, [#allocation5], %s529_s25, %s529_s25, %s530_s26  }
  0x13   :  { %s531_s29 = smov [#allocation7]   ;;  %s478_s7 = scalar_lea.hbm %s614_s2, 1024 }
  0x14   :  { %s32_s30 = sshll.u32 %s531_s29, 4  ;;  %p479_p8 = scmp.ne.s32.totalorder %s614_s2, %s478_s7  ;;  %s33_s30 = int_to_ptr.vmem [resolvable:$true] %s32_s30 }
  0x15   :  { %p482_p9 = scmp.lt.u32.totalorder %s478_s7, %s614_s2 }
  0x17   :  { %p484_p10 = pnand %p482_p9, %p479_p8 }
  0x19   :  { %487 = shalt.err (!%p484_p10)
}
  0x1a   :  { %s488_s12 = scalar_lea.vmem %s33_s30, 1024  ;;  %p493_p12 = scmp.lt.s32.totalorder %s33_s30, %s33_s30 }
  0x1b   :  { %p489_p11 = scmp.ne.s32.totalorder %s33_s30, %s488_s12  ;;  %p494_p13 = scmp.lt.s32.totalorder %s488_s12, %s488_s12 }
  0x1d   :  { %p495_p0 = por %p494_p13, %p493_p12 }
  0x1f   :  { %p496_p1 = pnand %p495_p0, %p489_p11 }
  0x21   :  { %499 = shalt.err (!%p496_p1)
}
  0x22   :  { %38 = dma.hbm_to_vmem [thread:$0]  %s614_s2, 1024, %s33_s30, [#allocation8], %s529_s25, %s529_s25, %s530_s26  }
  0x23   :  { %522 = dma.done.wait [#allocation5], 1024  }
  0x24   :  { %523 = vsyncadd [#allocation5], 4294966272 }
  0x25   :  { %524 = dma.done.wait [#allocation8], 1024  }
  0x26   :  { %525 = vsyncadd [#allocation8], 4294966272  ;;  %v60_v0 = vld [vmem:[#allocation7] sm:$0xff]  ;;  %v61_v1 = vld [vmem:[#allocation7 + $0x8] sm:$0xff]  ;;  %vm68_vm0 = vcmask 523264   ;;  %v532_v20 = vmov 0.0|0.0  }
  0x27   :  { %v62_v2 = vld [vmem:[#allocation7 + $0x10] sm:$0xff]  ;;  %v416_v3 = vpack.c.bf16 %v61_v1, %v60_v0  ;;  %v63_v4 = vld [vmem:[#allocation7 + $0x18] sm:$0xff]  ;;  %v64_v6 = vld [vmem:[#allocation7 + $0x20] sm:$0xff]  ;;  %432 = vmatprep.subr.bf16.mxu1 %v532_v20  ;;  %vm533_vm1 = vmmov 0   ;;  %v534_v21 = vmov 0.0   ;;  %s535_s16 = smov [#allocation9]  }
  0x28   :  { %v420_v5 = vpack.c.bf16 %v63_v4, %v62_v2  ;;  %v65_v7 = vld [vmem:[#allocation7 + $0x28] sm:$0xff]  ;;  %v52_v8 = vld [vmem:[#allocation4] sm:$0xff]  ;;  %v66_v10 = vld [vmem:[#allocation7 + $0x30] sm:$0xff]  ;;  %413 = vmatprep.mubr.msk.f32.mxu1 %vm533_vm1, %v534_v21  ;;  %v316_v4 = vstv %s612_s0  ;;  %s325_s17 = sshll.u32 %s535_s16, 4  ;;  %s326_s17 = int_to_ptr.vmem [resolvable:$true] %s325_s17 }
  0x29   :  { %417 = vmatprep.subr.bf16.mxu0 %v416_v3  ;;  %385 = vmatprep.mubr.msk.f32.mxu0 %vm68_vm0, %v52_v8  ;;  %v424_v9 = vpack.c.bf16 %v65_v7, %v64_v6  ;;  %v67_v11 = vld [vmem:[#allocation7 + $0x38] sm:$0xff]  ;;  %v53_v13 = vld [vmem:[#allocation4 + $0x8] sm:$0xff]  ;;  %v54_v14 = vld [vmem:[#allocation4 + $0x10] sm:$0xff]  ;;  %s500_s18 = scalar_lea.vmem %s326_s17, 128  ;;  %p505_p3 = scmp.lt.s32.totalorder %s326_s17, %s326_s17 }
  0x2a   :  { %419 = vmatpush3.bf16.msra.mxu0 %v416_v3  ;;  %v428_v12 = vpack.c.bf16 %v67_v11, %v66_v10  ;;  %v55_v15 = vld [vmem:[#allocation4 + $0x18] sm:$0xff]  ;;  %v56_v16 = vld [vmem:[#allocation4 + $0x20] sm:$0xff]  ;;  %v57_v17 = vld [vmem:[#allocation4 + $0x28] sm:$0xff]  ;;  %p501_p2 = scmp.ne.s32.totalorder %s326_s17, %s500_s18  ;;  %p506_p4 = scmp.lt.s32.totalorder %s500_s18, %s500_s18 }
  0x2b   :  { %421 = vmatprep.subr.bf16.mxu0 %v420_v5  ;;  %v58_v18 = vld [vmem:[#allocation4 + $0x30] sm:$0xff]  ;;  %v59_v19 = vld [vmem:[#allocation4 + $0x38] sm:$0xff]  ;;  %v207_v42 = vld [vmem:[%s615_s3] sm:$0xff] }
  0x2c   :  { %p507_p5 = por %p506_p4, %p505_p3 }
  0x2e   :  { %423 = vmatpush3.bf16.msra.mxu0 %v420_v5  ;;  %p508_p6 = pnand %p507_p5, %p501_p2 }
  0x2f   :  { %425 = vmatprep.subr.bf16.mxu0 %v424_v9 }
  0x32   :  { %427 = vmatpush3.bf16.msra.mxu0 %v424_v9 }
  0x33   :  { %429 = vmatprep.subr.bf16.mxu0 %v428_v12 }
  0x36   :  { %431 = vmatpush3.bf16.msra.mxu0 %v428_v12 }
  0x39   :  { %386 = vmatmul.mubr.msk.f32.vlgmr.msra.gmra.mrb[0].mxu0 %vm68_vm0, %v53_v13 }
  0x3a   :  { %388 = vmatprep.mubr.msk.f32.mxu0 %vm68_vm0, %v54_v14 }
  0x3d   :  { %389 = vmatmul.mubr.msk.f32.gmra.mrb[2].mxu0 %vm68_vm0, %v55_v15 }
  0x3e   :  { %391 = vmatprep.mubr.msk.f32.mxu0 %vm68_vm0, %v56_v16 }
  0x41   :  { %392 = vmatmul.mubr.msk.f32.gmra.mrb[4].mxu0 %vm68_vm0, %v57_v17 }
  0x42   :  { %394 = vmatprep.mubr.msk.f32.mxu0 %vm68_vm0, %v58_v18 }
  0x45   :  { %395 = vmatmul.mubr.msk.f32.gmra.mrb[6].mxu0 %vm68_vm0, %v59_v19 }
 0x10c   :  { %v387_v22 = vpop.f32.mrb[0].mxu0 }
 0x10d   :  { %v199_v23 = vmax.f32 %v387_v22, 0.0  ;;  %v159_v24 = vpop.f32.mrb[1].mxu0 }
 0x10e   :  { %v198_v25 = vmax.f32 %v159_v24, 0.0 }
 0x110   :  { %v390_v26 = vpop.f32.mrb[2].mxu0  ;;  %v433_v27 = vpack.c.bf16 %v199_v23, %v198_v25 }
 0x111   :  { %v201_v28 = vmax.f32 %v390_v26, 0.0  ;;  %v169_v29 = vpop.f32.mrb[3].mxu0 }
 0x112   :  { %v200_v30 = vmax.f32 %v169_v29, 0.0  ;;  %434 = vmatpush3.bf16.msra.mxu1 %v433_v27 }
 0x113   :  { %435 = vmatprep.subr.bf16.mxu1 %v532_v20 }
 0x114   :  { %v436_v31 = vpack.c.bf16 %v201_v28, %v200_v30  ;;  %v393_v32 = vpop.f32.mrb[4].mxu0 }
 0x115   :  { %v203_v33 = vmax.f32 %v393_v32, 0.0  ;;  %v179_v34 = vpop.f32.mrb[5].mxu0 }
 0x116   :  { %v202_v35 = vmax.f32 %v179_v34, 0.0  ;;  %437 = vmatpush3.bf16.msra.mxu1 %v436_v31 }
 0x117   :  { %438 = vmatprep.subr.bf16.mxu1 %v532_v20 }
 0x118   :  { %v439_v36 = vpack.c.bf16 %v203_v33, %v202_v35  ;;  %v396_v37 = vpop.f32.mrb[6].mxu0 }
 0x119   :  { %v205_v38 = vmax.f32 %v396_v37, 0.0  ;;  %v189_v39 = vpop.f32.mrb[7].mxu0 }
 0x11a   :  { %v204_v40 = vmax.f32 %v189_v39, 0.0  ;;  %440 = vmatpush3.bf16.msra.mxu1 %v439_v36 }
 0x11b   :  { %441 = vmatprep.subr.bf16.mxu1 %v532_v20 }
 0x11c   :  { %v442_v41 = vpack.c.bf16 %v205_v38, %v204_v40 }
 0x11e   :  { %443 = vmatpush3.bf16.msra.mxu1 %v442_v41 }
 0x121   :  { %414 = vmatmul.mubr.msk.f32.vlgmr.msra.gmra.mrb[0].mxu1 %vm68_vm0, %v207_v42 }
 0x1f4   :  { %v277_v43 = vpop.f32.mrb[0].mxu1 }
 0x1f5   :  { %v287_v44 = vrot.slane %v277_v43, 4  ;;  %v415_v45 = vpop.f32.mrb[1].mxu1 }
 0x1f7   :  { %v288_v46 = vadd.f32 %v287_v44, %v277_v43 }
 0x1f9   :  { %v289_v47 = vrot.slane %v288_v46, 2 }
 0x1fb   :  { %v290_v48 = vadd.f32 %v289_v47, %v288_v46 }
 0x1fd   :  { %v291_v49 = vrot.slane %v290_v48, 1 }
 0x1ff   :  { %v292_v50 = vadd.f32 %v291_v49, %v290_v48 }
 0x201   :  { %v294_v51 = vmul.f32 0.125, %v292_v50 }
 0x203   :  { %v295_v52 = vsub.f32 %v277_v43, %v294_v51 }
 0x205   :  { %v296_v53 = vmul.f32 %v295_v52, %v295_v52 }
 0x207   :  { %v297_v54 = vrot.slane %v296_v53, 4 }
 0x209   :  { %v298_v55 = vadd.f32 %v297_v54, %v296_v53 }
 0x20b   :  { %v299_v56 = vrot.slane %v298_v55, 2 }
 0x20d   :  { %v300_v57 = vadd.f32 %v299_v56, %v298_v55 }
 0x20f   :  { %v301_v58 = vrot.slane %v300_v57, 1 }
 0x211   :  { %v302_v59 = vadd.f32 %v301_v58, %v300_v57 }
 0x213   :  { %v304_v60 = vmul.f32 0.14285715, %v302_v59 }
 0x215   :  { %452 = vrsqrt.f32 %v304_v60  ;;  %vm307_vm2 = vcmp.eq.f32.partialorder %v304_v60, inf  ;;  %v310_v63 = vand.u32 2147483648, %v304_v60  ;;  %vm309_vm3 = vcmp.eq.f32.partialorder %v304_v60, 0.0 }
 0x21f   :  { %v453_v61 = vpop.eup %452 }
 0x220   :  { %v306_v62 = vmul.f32 %v453_v61, %v304_v60 }
 0x222   :  { %v308_v0 = vsel %vm307_vm2, %v304_v60, %v306_v62 }
 0x223   :  { %v311_v1 = vsel %vm309_vm3, %v310_v63, %v308_v0 }
 0x224   :  { %v312_v2 = vadd.f32 1e-06, %v311_v1 }
 0x226   :  { %454 = vrcp.f32 %v312_v2 }
 0x230   :  { %v455_v3 = vpop.eup %454 }
 0x231   :  { %v314_v5 = vmul.f32 %v455_v3, %v295_v52 }
 0x233   :  { %v317_v6 = vmul.f32 %v316_v4, %v314_v5 }
 0x235   :  { %318 = vst [vmem:[#allocation9] sm:$0xff] %v317_v6 }
 0x236   :  { %511 = shalt.err (!%p508_p6)
}
 0x237   :  { %s512_s21 = scalar_lea.hbm %s616_s4, 128 }
 0x238   :  { %p513_p7 = scmp.ne.s32.totalorder %s616_s4, %s512_s21  ;;  %p516_p8 = scmp.lt.u32.totalorder %s512_s21, %s616_s4 }
 0x23a   :  { %p518_p9 = pnand %p516_p8, %p513_p7 }
 0x23c   :  { %521 = shalt.err (!%p518_p9)
}
 0x23d   :  { %328 = dma.vmem_to_hbm [thread:$0]  %s326_s17, 128, %s616_s4, [#allocation6]  }
 0x23e   :  { %526 = dma.done.wait [#allocation6], 128  }
 0x23f   :  { %527 = vsyncadd [#allocation6], 4294967168 }
 0x240   :  { %332 = vsyncpa [#allocation5], 1 }
 0x241   :  { %333 = vsyncpa [#allocation8], 1 }
 0x242   :  { %334 = vsyncpa [#allocation6], 1 }

</bundles_post_ra>
